<compile_context>
chip_gen: v6e
topology: v6e:2x2x1
jax: 0.10.0
libtpu: 0.0.40
codegen_flags: <defaults>
</compile_context>

<pallas_src>
import jax
import jax.numpy as jnp
from jax.experimental import pallas as pl
from jax.experimental.pallas import tpu as pltpu

_LANES = 1024            # lane extent per block (multiple of 128)
_MAX_BLOCK_ROWS = 1024   # 1024 * 1024 * 4 B = 4 MiB per block
_SPLIT_ROWS = 256        # slabs > 1 MiB get >= 2 grid steps (v7x megacore)


def _scale_kernel(scale_ref, x_ref, o_ref):
    """Multiply one (block_rows, _LANES) f32 tile by a scalar from SMEM."""
    o_ref[...] = x_ref[...] * scale_ref[0]


def _scale_slab(slab, scale1):
    """Scale a lane-dense (rows, _LANES) f32 slab in place via Pallas."""
    rows = slab.shape[0]

    if rows <= _SPLIT_ROWS:
        # Small slab: a single full block (block == full array dims).
        block_rows = rows
    else:
        # Split into >= 2 "parallel" steps (both v7x TensorCores), capped at
        # 4 MiB blocks for large clouds.
        half = -(-pl.cdiv(rows, 2) // 8) * 8
        block_rows = min(_MAX_BLOCK_ROWS, half)

    grid = (pl.cdiv(rows, block_rows),)

    return pl.pallas_call(
        _scale_kernel,
        out_shape=jax.ShapeDtypeStruct(slab.shape, slab.dtype),
        grid=grid,
        in_specs=[
            pl.BlockSpec(memory_space=pltpu.MemorySpace.SMEM),      # scale (1,)
            pl.BlockSpec((block_rows, _LANES), lambda i: (i, 0)),   # slab tile
        ],
        out_specs=pl.BlockSpec((block_rows, _LANES), lambda i: (i, 0)),
        input_output_aliases={1: 0},   # scale the slab in place (fully overwritten)
        compiler_params=pltpu.CompilerParams(
            dimension_semantics=("parallel",),
            vmem_limit_bytes=32 * 1024 * 1024,
        ),
    )(scale1, slab)


def _scale_backscan(pts, scale1):
    """Scale an (N, 3) f32 point cloud by a scalar using the Pallas kernel."""
    n, d = pts.shape
    total = n * d

    rows = max(8, pl.cdiv(total, _LANES))
    rows = -(-rows // 8) * 8          # multiple of 8 sublanes only
    padded = rows * _LANES

    flat = pts.reshape(-1)
    if padded != total:
        flat = jnp.pad(flat, (0, padded - total))
    slab = flat.reshape(rows, _LANES)

    out = _scale_slab(slab, scale1)

    out_flat = out.reshape(-1)
    if padded != total:
        out_flat = out_flat[:total]
    return out_flat.reshape(n, d)


@jax.jit
def _normalize(backscan, esl, isl, sp_stack, c7, dr, dl, norm_length):
    # Scalar spine length / scale (plain scalar math; cheap, done once).
    dm = (dr + dl) * jnp.float32(0.5)
    diff = c7 - dm
    spine_length = jnp.sqrt(jnp.sum(diff * diff))
    scale = (norm_length / spine_length).astype(jnp.float32)   # = 1 / norm

    # Large point cloud -> Pallas kernel (in-place scalar multiply).
    back_s = _scale_backscan(backscan, scale.reshape(1))

    # Tiny arrays (<1 KiB total) -> plain fused XLA multiplies.
    esl_s = esl * scale
    isl_s = isl * scale
    sp_s = sp_stack * scale
    return back_s, esl_s, isl_s, sp_s


class SpineLengthNormalization:
    """Pallas/JAX port of spinediffusion SpineLengthNormalization."""

    def __init__(self, norm_length: float, **kwargs):
        self.norm_length = float(norm_length)

    def __call__(self, data_id: dict) -> dict:
        sp = data_id["special_points"]
        keys = list(sp.keys())

        sp_stack = jnp.stack(
            [jnp.asarray(sp[k], jnp.float32).reshape(3) for k in keys])  # (P, 3)
        c7 = jnp.asarray(sp["C7"], jnp.float32).reshape(3)
        dr = jnp.asarray(sp["DR"], jnp.float32).reshape(3)
        dl = jnp.asarray(sp["DL"], jnp.float32).reshape(3)

        back = jnp.asarray(data_id["backscan"], jnp.float32)
        esl = jnp.asarray(data_id["esl"], jnp.float32)
        isl = jnp.asarray(data_id["isl"], jnp.float32)
        nl = jnp.float32(self.norm_length)

        back_s, esl_s, isl_s, sp_s = _normalize(
            back, esl, isl, sp_stack, c7, dr, dl, nl)

        out = dict(data_id)
        # TODO(synk): 'backscan' is an open3d PointCloud in the original; here
        # it is represented directly as the (N, 3) array of its points.
        out["backscan"] = back_s
        out["esl"] = esl_s
        out["isl"] = isl_s
        out["special_points"] = {k: sp_s[i] for i, k in enumerate(keys)}
        return out


def _reference(data_id, norm_length):
    sp = data_id["special_points"]
    dm = (sp["DR"] + sp["DL"]) / 2.0
    spine_length = jnp.sqrt(jnp.sum((sp["C7"] - dm) ** 2))
    norm = spine_length / norm_length
    return {
        "backscan": data_id["backscan"] / norm,
        "esl": data_id["esl"] / norm,
        "isl": data_id["isl"] / norm,
        "special_points": {k: v / norm for k, v in sp.items()},
    }


if __name__ == "__main__":
    key = jax.random.PRNGKey(0)
    k_back, k_esl, k_isl, k_sp = jax.random.split(key, 4)

    data_id = {
        "backscan": jax.random.normal(k_back, (200, 3), dtype=jnp.float32) * 100.0,
        "esl": jax.random.normal(k_esl, (64, 3), dtype=jnp.float32) * 50.0,
        "isl": jax.random.normal(k_isl, (48, 3), dtype=jnp.float32) * 50.0,
        "special_points": {
            "C7": jnp.array([0.0, 10.0, 95.0], dtype=jnp.float32),
            "DR": jnp.array([-8.0, 5.0, 1.0], dtype=jnp.float32),
            "DL": jnp.array([8.0, 5.0, -1.0], dtype=jnp.float32),
            "SP": jax.random.normal(k_sp, (3,), dtype=jnp.float32) * 20.0,
        },
    }

    norm_length = 2.0
    module = SpineLengthNormalization(norm_length=norm_length)

    out = module(data_id)
    jax.block_until_ready(out["backscan"])
    jax.block_until_ready(out["esl"])
    jax.block_until_ready(out["isl"])
    for v in out["special_points"].values():
        jax.block_until_ready(v)

    ref = _reference(data_id, norm_length)
    assert jnp.allclose(out["backscan"], ref["backscan"], rtol=1e-4, atol=1e-4)
    assert jnp.allclose(out["esl"], ref["esl"], rtol=1e-4, atol=1e-4)
    assert jnp.allclose(out["isl"], ref["isl"], rtol=1e-4, atol=1e-4)
    for k in data_id["special_points"]:
        assert jnp.allclose(out["special_points"][k],
                            ref["special_points"][k], rtol=1e-4, atol=1e-4)

    print("KERNEL_OK")
</pallas_src>

<mosaic_0001>
module attributes {stable_mosaic.version = 11 : i64} {
  func.func @_scale_kernel(%arg0: i32, %arg1: memref<1xf32, #tpu.memory_space<smem>>, %arg2: memref<8x1024xf32, #tpu.memory_space<vmem>>, %arg3: memref<8x1024xf32, #tpu.memory_space<vmem>>) attributes {dimension_semantics = [#tpu.dimension_semantics<parallel>], iteration_bounds = array<i64: 1>, scalar_prefetch = 0 : i64, scratch_operands = 0 : i64, tpu.core_type = #tpu.core_type<tc>, window_params = [{transform_indices = @transform_0, window_bounds = array<i64: 1>}, {transform_indices = @transform_1, window_bounds = array<i64: 8, 1024>}, {transform_indices = @transform_2, window_bounds = array<i64: 8, 1024>}]} {
    %c0 = arith.constant 0 : index
    %c0_0 = arith.constant 0 : index
    %0 = vector.load %arg2[%c0, %c0_0] : memref<8x1024xf32, #tpu.memory_space<vmem>>, vector<8x1024xf32>
    %c0_1 = arith.constant 0 : index
    %1 = memref.load %arg1[%c0_1] : memref<1xf32, #tpu.memory_space<smem>>
    %2 = vector.broadcast %1 : f32 to vector<8x1024xf32>
    %3 = arith.mulf %0, %2 : vector<8x1024xf32>
    %c0_2 = arith.constant 0 : index
    %c0_3 = arith.constant 0 : index
    %4 = vector.load %arg3[%c0_2, %c0_3] : memref<8x1024xf32, #tpu.memory_space<vmem>>, vector<8x1024xf32>
    tpu.vector_store %arg3[%c0_2, %c0_3], %3 {strides = array<i32>} : memref<8x1024xf32, #tpu.memory_space<vmem>>, vector<8x1024xf32>,
    return
  }
  func.func @transform_0(%arg0: i32) -> i32 {
    %c0_i32 = arith.constant 0 : i32
    %c0_i32_0 = arith.constant 0 : i32
    return %c0_i32 : i32
  }
  func.func @transform_1(%arg0: i32) -> (i32, i32) {
    %c0_i32 = arith.constant 0 : i32
    %c0_i32_0 = arith.constant 0 : i32
    return %arg0, %c0_i32 : i32, i32
  }
  func.func @transform_2(%arg0: i32) -> (i32, i32) {
    %c0_i32 = arith.constant 0 : i32
    %c0_i32_0 = arith.constant 0 : i32
    return %arg0, %c0_i32 : i32, i32
  }
}

</mosaic_0001>

<bundles_post_ra>
// kernel: _normalize.1
= control target key start
LH: loop header
LB: loop body
LE: loop exit
PB: predicated region body
PF: predicated region fallthrough
CT: control target
= control target key end

     0   :  { %s108_s0 = inlined_call_operand.<no memory space> [shape: f32[1], index: 0, kind: input, shape index: {}]   ;;  %s109_s1 = inlined_call_operand.vmem [shape: f32[8,1024], index: 1, kind: input, shape index: {}, may-alias: {1,2}]   ;;  %s110_s2 = inlined_call_operand.vmem [shape: f32[8,1024], index: 2, kind: output, shape index: {}, may-alias: {1,2}]  }
   0x1   :  { %v12_v0 = vld [vmem:[%s109_s1] sm:$0xff]  ;;  %v21_v1 = vstv %s108_s0  ;;  %v13_v2 = vld [vmem:[%s109_s1 + $0x8] sm:$0xff]  ;;  %v14_v3 = vld [vmem:[%s109_s1 + $0x10] sm:$0xff] }
   0x2   :  { %v22_v4 = vmul.f32 %v21_v1, %v12_v0  ;;  %v23_v5 = vmul.f32 %v21_v1, %v13_v2  ;;  %v24_v6 = vmul.f32 %v21_v1, %v14_v3  ;;  %v15_v7 = vld [vmem:[%s109_s1 + $0x18] sm:$0xff]  ;;  %v16_v8 = vld [vmem:[%s109_s1 + $0x20] sm:$0xff]  ;;  %v17_v9 = vld [vmem:[%s109_s1 + $0x28] sm:$0xff] }
   0x3   :  { %v25_v10 = vmul.f32 %v21_v1, %v15_v7  ;;  %v26_v11 = vmul.f32 %v21_v1, %v16_v8  ;;  %v27_v12 = vmul.f32 %v21_v1, %v17_v9  ;;  %v18_v13 = vld [vmem:[%s109_s1 + $0x30] sm:$0xff]  ;;  %v19_v14 = vld [vmem:[%s109_s1 + $0x38] sm:$0xff] }
   0x4   :  { %30 = vst [vmem:[%s110_s2] sm:$0xff] %v22_v4  ;;  %31 = vst [vmem:[%s110_s2 + $0x8] sm:$0xff] %v23_v5  ;;  %v28_v15 = vmul.f32 %v21_v1, %v18_v13  ;;  %v29_v16 = vmul.f32 %v21_v1, %v19_v14 }
   0x5   :  { %32 = vst [vmem:[%s110_s2 + $0x10] sm:$0xff] %v24_v6  ;;  %33 = vst [vmem:[%s110_s2 + $0x18] sm:$0xff] %v25_v10 }
   0x6   :  { %34 = vst [vmem:[%s110_s2 + $0x20] sm:$0xff] %v26_v11  ;;  %35 = vst [vmem:[%s110_s2 + $0x28] sm:$0xff] %v27_v12 }
   0x7   :  { %36 = vst [vmem:[%s110_s2 + $0x30] sm:$0xff] %v28_v15  ;;  %37 = vst [vmem:[%s110_s2 + $0x38] sm:$0xff] %v29_v16 }

</bundles_post_ra>
